<compile_context>
chip_gen: v7x
topology: tpu7x:2x2x1
jax: 0.10.0
libtpu: 0.0.40
codegen_flags: <defaults>
</compile_context>

<pallas_src>
import functools

import jax
import jax.numpy as jnp
from jax.experimental import pallas as pl
from jax.experimental.pallas import tpu as pltpu


# ---------------------------------------------------------------------------
# VMEM budgeting (generation aware).
# ---------------------------------------------------------------------------
def _vmem_budget():
    """Returns (per-pipeline-buffer byte budget, vmem_limit_bytes)."""
    try:
        cap = int(getattr(pltpu.get_tpu_info(), "vmem_capacity_bytes", 0))
    except Exception:  # not on a TPU / interpret mode
        cap = 0
    if cap >= 100 * 1024 * 1024:          # v5e / v6e: 128 MiB physical VMEM
        return 8 * 1024 * 1024, 64 * 1024 * 1024
    # v7x (64 MiB per TensorCore) or unknown: stay conservative.
    return 4 * 1024 * 1024, 32 * 1024 * 1024


def _per_row_bytes(s, d, itemsize):
    # Double-buffered native-dtype input block plus in-kernel f32 temporaries
    # (conservative: the kernel only keeps one 8-sublane f32 chunk live at a time).
    return s * d * (2 * itemsize + 8)


def _choose_block_rows(batch, s, d, itemsize, budget_bytes):
    """Batch rows per grid step: the VMEM byte budget is the primary constraint."""
    per_row = max(1, _per_row_bytes(s, d, itemsize))
    tb = max(1, budget_bytes // per_row)
    tb = min(tb, 2048)
    if batch >= 2:
        # Keep >= 2 (ideally ~4) grid steps so v7x's two TensorCores both get work.
        tb = min(tb, max(1, -(-batch // 4)))
    if tb >= batch:
        return batch
    if tb >= 8:
        tb = (tb // 8) * 8                # full-sublane input DMAs
    return max(tb, 1)


# ---------------------------------------------------------------------------
# Kernels.
# ---------------------------------------------------------------------------
def _aggregator_kernel(x_ref, o_ref):
    """Common path: TB batch rows per grid step, full context set resident.

    x_ref: (TB, S, D) native dtype.  o_ref: (TB, 2, D): row 0 = mean, row 1 = var.
    Two-pass moments (mean, then sum of squared deviations) match torch.var
    numerics; the S axis is walked in 8-sublane chunks so only one small f32
    chunk is live at a time (no full (TB, S, D) f32 temporary).
    """
    tb, s, d = x_ref.shape
    ch = 8
    n_full = s // ch
    rem = s - n_full * ch
    unroll = n_full <= 8

    def load_chunk(start, size):
        return x_ref[:, pl.ds(start, size), :].astype(jnp.float32)

    # ---- pass 1: mean ----
    sum_x = jnp.zeros((tb, d), jnp.float32)
    if n_full > 0:
        def body1(i, acc):
            start = pl.multiple_of(i * ch, ch)
            return acc + jnp.sum(load_chunk(start, ch), axis=1)
        sum_x = jax.lax.fori_loop(0, n_full, body1, sum_x, unroll=unroll)
    if rem > 0:
        sum_x = sum_x + jnp.sum(load_chunk(n_full * ch, rem), axis=1)
    mean = sum_x * (1.0 / s)

    # ---- pass 2: unbiased variance (torch.var default, ddof = 1) ----
    # TODO(synk): if a bundle dump shows the 2 XLU units saturating on v6e/v7x,
    # accumulate sublane groups with plain VPU adds (or an MXU ones-dot) and do a
    # single final 8-sublane reduce per output tile.
    mexp = mean[:, None, :]
    ssd = jnp.zeros((tb, d), jnp.float32)
    if n_full > 0:
        def body2(i, acc):
            start = pl.multiple_of(i * ch, ch)
            c = load_chunk(start, ch) - mexp
            return acc + jnp.sum(c * c, axis=1)
        ssd = jax.lax.fori_loop(0, n_full, body2, ssd, unroll=unroll)
    if rem > 0:
        c = load_chunk(n_full * ch, rem) - mexp
        ssd = ssd + jnp.sum(c * c, axis=1)
    var = ssd * (1.0 / (s - 1))

    o_ref[:, 0, :] = mean.astype(o_ref.dtype)
    o_ref[:, 1, :] = var.astype(o_ref.dtype)


def _aggregator_kernel_s_tiled(x_ref, o_ref, sum_ref, sumsq_ref, *, s_total):
    """Large-S path: grid axis 1 walks the context set ('arbitrary', innermost).

    f32 (sum, sumsq) VMEM scratch accumulators persist across the S axis
    (init at s==0, finalize at s==last).  Single-pass moments here since a
    two-pass scheme cannot span grid steps without a second sweep.
    """
    si = pl.program_id(1)

    @pl.when(si == 0)
    def _():
        sum_ref[...] = jnp.zeros_like(sum_ref)
        sumsq_ref[...] = jnp.zeros_like(sumsq_ref)

    x = x_ref[...].astype(jnp.float32)          # (TB, TS, D)
    ts = x.shape[1]
    if s_total % ts != 0:
        # Mask the padded tail of the last (partial) context-set block.
        idx = jax.lax.broadcasted_iota(jnp.int32, x.shape, 1) + si * ts
        x = jnp.where(idx < s_total, x, 0.0)
    sum_ref[...] += jnp.sum(x, axis=1)
    sumsq_ref[...] += jnp.sum(x * x, axis=1)

    @pl.when(si == pl.num_programs(1) - 1)
    def _():
        s_sum = sum_ref[...]
        mean = s_sum * (1.0 / s_total)
        var = (sumsq_ref[...] - mean * s_sum) * (1.0 / (s_total - 1))
        var = jnp.maximum(var, 0.0)             # guard fp round-off (torch's var is >= 0 too)
        o_ref[:, 0, :] = mean.astype(o_ref.dtype)
        o_ref[:, 1, :] = var.astype(o_ref.dtype)


# ---------------------------------------------------------------------------
# Wrapper.
# ---------------------------------------------------------------------------
def aggregator_forward(representations: jax.Array, variance: bool = True,
                       *, s_block=None) -> jax.Array:
    """Pallas equivalent of Aggregator(variance=True, mlp_sizes=None).forward."""
    B, S, D = representations.shape

    if S == 1:
        # PyTorch branch: mean = representations (set dim kept), var = zeros_like(mean).
        if variance:
            return jnp.concatenate(
                [representations, jnp.zeros_like(representations)], axis=-1)
        return jnp.mean(representations, axis=-2)

    if not variance:
        # TODO(synk): variance=False (mean-only) path kept in plain JAX; the kernels
        # below cover the module-default variance=True hot path.
        return jnp.mean(representations, axis=-2)

    itemsize = representations.dtype.itemsize
    budget, vmem_limit = _vmem_budget()
    rows_fit = budget // max(1, _per_row_bytes(S, D, itemsize))

    if s_block is None and rows_fit >= min(8, B):
        # ---- common path: whole context set per grid step, batch tiled ----
        TB = _choose_block_rows(B, S, D, itemsize, budget)
        n_b = pl.cdiv(B, TB)      # partial last batch block handled by Pallas masking
        # TODO(synk): with very few grid steps, pipeline_mode=pl.Buffered(3) on the
        # input BlockSpec could hide a bit more DMA latency.
        out = pl.pallas_call(
            _aggregator_kernel,
            out_shape=jax.ShapeDtypeStruct((B, 2, D), representations.dtype),
            grid_spec=pltpu.PrefetchScalarGridSpec(
                num_scalar_prefetch=0,
                grid=(n_b,),
                in_specs=[pl.BlockSpec((TB, S, D), lambda b: (b, 0, 0))],
                out_specs=pl.BlockSpec((TB, 2, D), lambda b: (b, 0, 0)),
            ),
            compiler_params=pltpu.CompilerParams(
                dimension_semantics=("parallel",),
                vmem_limit_bytes=vmem_limit),
        )(representations)
    else:
        # ---- large-S path: tile the context set as an inner 'arbitrary' axis ----
        if s_block is not None:
            TS = int(s_block)
        else:
            tb_target = min(8, B)
            ts_fit = budget // max(1, tb_target * D * (2 * itemsize + 8))
            TS = max(8, (ts_fit // 8) * 8)
        TS = min(TS, S)
        if TS < S and TS % 8 != 0:              # (8,128) constraint on the S block dim
            TS = min(S, max(8, (TS // 8) * 8))
        TB = _choose_block_rows(B, TS, D, itemsize, budget)
        n_b = pl.cdiv(B, TB)
        n_s = pl.cdiv(S, TS)
        kernel = functools.partial(_aggregator_kernel_s_tiled, s_total=S)
        out = pl.pallas_call(
            kernel,
            out_shape=jax.ShapeDtypeStruct((B, 2, D), representations.dtype),
            grid_spec=pltpu.PrefetchScalarGridSpec(
                num_scalar_prefetch=0,
                grid=(n_b, n_s),
                in_specs=[pl.BlockSpec((TB, TS, D), lambda b, s: (b, s, 0))],
                out_specs=pl.BlockSpec((TB, 2, D), lambda b, s: (b, 0, 0)),
                scratch_shapes=[pltpu.VMEM((TB, D), jnp.float32),
                                pltpu.VMEM((TB, D), jnp.float32)],
            ),
            compiler_params=pltpu.CompilerParams(
                dimension_semantics=("parallel", "arbitrary"),
                vmem_limit_bytes=vmem_limit),
        )(representations)

    # (B, 2, D) -> (B, 2*D): row-major reshape == concat([mean, var], axis=-1).
    return out.reshape(B, 2 * D)


if __name__ == "__main__":
    key = jax.random.PRNGKey(0)
    k1, k2, k3, k4 = jax.random.split(key, 4)

    def ref_agg(x):
        return jnp.concatenate(
            [jnp.mean(x, axis=-2), jnp.var(x, axis=-2, ddof=1)], axis=-1)

    # 1) lane-aligned feature dim; batch split across multiple grid steps.
    x1 = jax.random.normal(k1, (4, 8, 128), dtype=jnp.float32)
    o1 = jax.block_until_ready(aggregator_forward(x1))
    assert o1.shape == (4, 256), o1.shape
    assert jnp.allclose(o1, ref_agg(x1), atol=1e-5, rtol=1e-5), "mismatch (D=128)"

    # 2) non-128 feature dim, odd context size, partial last batch block (no padding).
    x2 = jax.random.normal(k2, (5, 7, 96), dtype=jnp.float32)
    o2 = jax.block_until_ready(aggregator_forward(x2))
    assert o2.shape == (5, 192), o2.shape
    assert jnp.allclose(o2, ref_agg(x2), atol=1e-5, rtol=1e-5), "mismatch (D=96)"

    # 3) force the S-tiled (large context set) path, with a partial S block.
    x3 = jax.random.normal(k3, (4, 20, 64), dtype=jnp.float32)
    o3 = jax.block_until_ready(aggregator_forward(x3, s_block=8))
    assert o3.shape == (4, 128), o3.shape
    assert jnp.allclose(o3, ref_agg(x3), atol=1e-4, rtol=1e-4), "mismatch (S-tiled)"

    # 4) bf16 inputs through the main kernel (f32 accumulation inside).
    x4 = jax.random.normal(k4, (4, 8, 128), dtype=jnp.float32).astype(jnp.bfloat16)
    o4 = jax.block_until_ready(aggregator_forward(x4))
    ref4 = ref_agg(x4.astype(jnp.float32))
    assert o4.shape == (4, 256), o4.shape
    assert jnp.allclose(o4.astype(jnp.float32), ref4, atol=2e-2, rtol=2e-2), "mismatch (bf16)"

    # 5) context_set_size == 1 branch (plain JAX, keeps the set dim like torch).
    x5 = jnp.ones((3, 1, 16), dtype=jnp.float32) * 2.0
    o5 = jax.block_until_ready(aggregator_forward(x5))
    assert o5.shape == (3, 1, 32), o5.shape
    assert jnp.allclose(o5[..., :16], 2.0) and jnp.allclose(o5[..., 16:], 0.0)

    print("KERNEL_OK")
</pallas_src>

<mosaic_0001>
module attributes {stable_mosaic.version = 11 : i64} {
  func.func @_aggregator_kernel(%arg0: i32, %arg1: memref<1x8x128xf32, #tpu.memory_space<vmem>>, %arg2: memref<1x2x128xf32, #tpu.memory_space<vmem>>) attributes {dimension_semantics = [#tpu.dimension_semantics<parallel>], iteration_bounds = array<i64: 4>, scalar_prefetch = 0 : i64, scratch_operands = 0 : i64, tpu.core_type = #tpu.core_type<tc>, window_params = [{transform_indices = @transform_0, window_bounds = array<i64: 1, 8, 128>}, {transform_indices = @transform_1, window_bounds = array<i64: 1, 2, 128>}]} {
    %cst = arith.constant 0.000000e+00 : f32
    %0 = vector.broadcast %cst : f32 to vector<1x128xf32>
    %c0_i32 = arith.constant 0 : i32
    %c8_i32 = arith.constant 8 : i32
    %1 = arith.muli %c0_i32, %c8_i32 : i32
    %2 = tpu.assume_multiple %1, 8 : i32
    %c0 = arith.constant 0 : index
    %3 = arith.index_cast %2 : i32 to index
    %c0_0 = arith.constant 0 : index
    %4 = vector.load %arg1[%c0, %3, %c0_0] : memref<1x8x128xf32, #tpu.memory_space<vmem>>, vector<1x8x128xf32>
    %cst_1 = arith.constant dense<0.000000e+00> : vector<1x128xf32>
    %5 = vector.multi_reduction <add>, %4, %cst_1 [1] : vector<1x8x128xf32> to vector<1x128xf32>
    %6 = arith.addf %0, %5 : vector<1x128xf32>
    %c1_i32 = arith.constant 1 : i32
    %cst_2 = arith.constant 1.250000e-01 : f32
    %7 = vector.broadcast %cst_2 : f32 to vector<1x128xf32>
    %8 = arith.mulf %6, %7 : vector<1x128xf32>
    %9 = vector.shape_cast %8 : vector<1x128xf32> to vector<1x1x128xf32>
    %cst_3 = arith.constant 0.000000e+00 : f32
    %10 = vector.broadcast %cst_3 : f32 to vector<1x128xf32>
    %c0_i32_4 = arith.constant 0 : i32
    %c8_i32_5 = arith.constant 8 : i32
    %11 = arith.muli %c0_i32_4, %c8_i32_5 : i32
    %12 = tpu.assume_multiple %11, 8 : i32
    %c0_6 = arith.constant 0 : index
    %13 = arith.index_cast %12 : i32 to index
    %c0_7 = arith.constant 0 : index
    %14 = vector.load %arg1[%c0_6, %13, %c0_7] : memref<1x8x128xf32, #tpu.memory_space<vmem>>, vector<1x8x128xf32>
    %15 = vector.broadcast %9 : vector<1x1x128xf32> to vector<1x8x128xf32>
    %16 = arith.subf %14, %15 : vector<1x8x128xf32>
    %17 = arith.mulf %16, %16 : vector<1x8x128xf32>
    %cst_8 = arith.constant dense<0.000000e+00> : vector<1x128xf32>
    %18 = vector.multi_reduction <add>, %17, %cst_8 [1] : vector<1x8x128xf32> to vector<1x128xf32>
    %19 = arith.addf %10, %18 : vector<1x128xf32>
    %c1_i32_9 = arith.constant 1 : i32
    %cst_10 = arith.constant 0.142857149 : f32
    %20 = vector.broadcast %cst_10 : f32 to vector<1x128xf32>
    %21 = arith.mulf %19, %20 : vector<1x128xf32>
    %c0_11 = arith.constant 0 : index
    %c0_12 = arith.constant 0 : index
    %c0_13 = arith.constant 0 : index
    %22 = vector.load %arg2[%c0_11, %c0_12, %c0_13] : memref<1x2x128xf32, #tpu.memory_space<vmem>>, vector<1x1x128xf32>
    %23 = vector.shape_cast %22 : vector<1x1x128xf32> to vector<1x128xf32>
    %24 = vector.shape_cast %8 : vector<1x128xf32> to vector<1x1x128xf32>
    tpu.vector_store %arg2[%c0_11, %c0_12, %c0_13], %24 {strides = array<i32>} : memref<1x2x128xf32, #tpu.memory_space<vmem>>, vector<1x1x128xf32>,
    %c0_14 = arith.constant 0 : index
    %c1 = arith.constant 1 : index
    %c0_15 = arith.constant 0 : index
    %25 = vector.load %arg2[%c0_14, %c1, %c0_15] : memref<1x2x128xf32, #tpu.memory_space<vmem>>, vector<1x1x128xf32>
    %26 = vector.shape_cast %25 : vector<1x1x128xf32> to vector<1x128xf32>
    %27 = vector.shape_cast %21 : vector<1x128xf32> to vector<1x1x128xf32>
    tpu.vector_store %arg2[%c0_14, %c1, %c0_15], %27 {strides = array<i32>} : memref<1x2x128xf32, #tpu.memory_space<vmem>>, vector<1x1x128xf32>,
    return
  }
  func.func @transform_0(%arg0: i32) -> (i32, i32, i32) {
    %c0_i32 = arith.constant 0 : i32
    %c0_i32_0 = arith.constant 0 : i32
    %c0_i32_1 = arith.constant 0 : i32
    return %arg0, %c0_i32, %c0_i32_0 : i32, i32, i32
  }
  func.func @transform_1(%arg0: i32) -> (i32, i32, i32) {
    %c0_i32 = arith.constant 0 : i32
    %c0_i32_0 = arith.constant 0 : i32
    %c0_i32_1 = arith.constant 0 : i32
    return %arg0, %c0_i32, %c0_i32_0 : i32, i32, i32
  }
}

</mosaic_0001>

<bundles_post_ra>
// kernel: tpu_custom_call.1
= control target key start
LH: loop header
LB: loop body
LE: loop exit
PB: predicated region body
PF: predicated region fallthrough
CT: control target
= control target key end

     0   :  { %6 = vsyncpa [#allocation3], 0  ;;  %s565_s0 = inlined_call_operand.hbm [shape: f32[4,8,128], index: 0, kind: input, shape index: {}]   ;;  %s566_s1 = inlined_call_operand.hbm [shape: f32[4,2,128], index: 1, kind: output, shape index: {}]  }
   0x1   :  { %8 = vsyncpa [#allocation3 + $0x1], 0 }
   0x2   :  { %9 = vsyncpa [#allocation4], 0 }
   0x3   :  { %11 = vsyncpa [#allocation4 + $0x1], 0  ;;  %s405_s6 = smov 0   ;;  %s407_s7 = smov 0  }
   0x4   :  { %s409_s8 = smov 0   ;;  %s411_s9 = smov 0  }
   0x5 LB: > { %s426_s10 = sadd.s32 4294967295, %s391_s9   ;;  %s237_s11 = sadd.s32 4294967294, %s391_s9   ;;  %s391_s9 = sphi %s411_s9, %s580_s9   ;;  %s387_s8 = sphi %s409_s8, %s579_s8   ;;  %s383_s7 = sphi %s407_s7, %s578_s7   ;;  %s379_s6 = sphi %s405_s6, %s577_s6  }
   0x6   : > { %s430_s12 = sadd.s32 1, %s391_s9   ;;  %s24_s13 = sadd.s32 1, %s387_s8 }
   0x7   : > { %s21_s14 = ssub.s32 %s391_s9, %s430_s12  ;;  %p31_p0 = scmp.ne.s32.totalorder %s387_s8, %s383_s7 }
   0x8   : > { %p22_p1 = scmp.eq.s32.totalorder %s21_s14, 0  ;;  %p32_p2 = scmp.eq.s32.totalorder %s391_s9, 0 }
   0x9   : > { %p37_p3 = scmp.ne.s32.totalorder %s383_s7, %s379_s6  ;;  %p38_p4 = scmp.eq.s32.totalorder %s426_s10, 0 }
   0xa   : > { %s442_s15 = scalar_select %p22_p1, %s387_s8, %s24_s13  }
   0xb   : > { %p444_p5 = por %p32_p2, %p31_p0  ;;  %p448_p6 = por %p38_p4, %p37_p3 }
   0xc   : > { %p61_p7 = scmp.eq.s32.totalorder %s426_s10, 3  ;;  %p67_p8 = scmp.eq.s32.totalorder %s237_s11, 3 }
   0xd   : > { %p261_p9 = scmp.lt.s32.totalorder %s391_s9, 4  ;;  %s87_s20 = sand.u32 1, %s387_s8  }
   0xe   : > { %p454_p10 = por %p61_p7, %p31_p0  ;;  %p458_p11 = por %p67_p8, %p37_p3 }
   0xf   : > { %s241_s21 = sshll.u32 %s391_s9, 7  ;;  %s240_s22 = sshll.u32 %s87_s20, 3 }
  0x10   : > { %s570_s18 = scalar_select %p454_p10, 1, 0 }
  0x11   : > { %s571_s19 = scalar_select %p458_p11, 1, 0 }
  0x12   : > { %s467_s25 = scalar_lea.hbm %s565_s0, %s241_s21  ;;  %s91_s26 = scalar_lea.vmem [#allocation2], %s240_s22 }
  0x13   : > { %s98_s27 = sshll.u32 %s91_s26, 4  ;;  %p471_p12 = pnand %p261_p9, %p444_p5  ;;  %s475_s27 = int_to_ptr.vmem [resolvable:$true] %s98_s27 }
  0x14   : > { %s88_s29 = scalar_lea.sflag [#allocation3], %s87_s20  ;;  %s295_s30 = scalar_lea.hbm %s467_s25, 128 }
  0x15   : > { %p296_p1 = scmp.ne.s32.totalorder %s467_s25, %s295_s30  ;;  %p297_p2 = pneg %p471_p12 }
  0x16   : > { %s300_s4 = scalar_lea.hbm %s565_s0, 512  ;;  %p301_p5 = scmp.lt.u32.totalorder %s467_s25, %s565_s0 }
  0x17   : > { %p298_p3 = pnand %p297_p2, %p296_p1  ;;  %p302_p7 = scmp.lt.u32.totalorder %s300_s4, %s295_s30 }
  0x18   : > { %p304_p9 = scmp.lt.u32.totalorder %s295_s30, %s467_s25 }
  0x19   : > { %p299_p4 = pneg %p298_p3  ;;  %p303_p8 = por %p302_p7, %p301_p5 }
  0x1b   : > { %p305_p13 = por %p304_p9, %p303_p8 }
  0x1d   : > { %p306_p0 = pnand %p305_p13, %p299_p4 }
  0x1f   : > { %309 = shalt.err (!%p306_p0)
}
  0x20   : > { %s310_s13 = scalar_lea.vmem %s475_s27, 128  ;;  %s393_s14 = smov [#allocation2]  }
  0x21   : > { %p311_p1 = scmp.ne.s32.totalorder %s475_s27, %s310_s13  ;;  %s315_s16 = sshll.u32 %s393_s14, 4  ;;  %s316_s16 = int_to_ptr.vmem [resolvable:$false] %s315_s16 }
  0x22   : > { %s317_s20 = scalar_lea.vmem %s316_s16, 256  ;;  %p318_p10 = scmp.lt.s32.totalorder %s475_s27, %s316_s16 }
  0x23   : > { %p313_p3 = pnand %p311_p1, %p297_p2  ;;  %p319_p5 = scmp.lt.s32.totalorder %s317_s20, %s310_s13 }
  0x25   : > { %p314_p11 = pneg %p313_p3  ;;  %p320_p7 = por %p319_p5, %p318_p10 }
  0x27   : > { %p321_p8 = pnand %p320_p7, %p314_p11 }
  0x29   : > { %324 = shalt.err (!%p321_p8)
}
  0x2a   : > { %256 = dma.hbm_to_vmem [thread:$0]  (!%p471_p12), %s467_s25, 128, %s475_s27, %s88_s29  }
  0x2b   : > { %p573_p13 = scmp.lt.s32.totalorder %s391_s9, 5  ;;  %p574_p0 = scmp.ge.s32.totalorder %s391_s9, 1 }
  0x2d   : > { %p104_p2 = pnand %p574_p0, %p573_p13 }
  0x2e   : > { %s509_s21 = sand.u32 (!%p104_p2), 1, %s383_s7  }
  0x2f   : > { %107 = sbr.rel (%p104_p2) target bundleno = 102 (0x66), region = 24  ;;  %s243_s22 = sshll.u32 (!%p104_p2), %s509_s21, 3 }
  0x30   : > { %s110_s23 = scalar_lea.sflag (!%p104_p2), [#allocation3], %s509_s21  ;;  %s113_s24 = scalar_lea.vmem (!%p104_p2), [#allocation2], %s243_s22 }
  0x36   : > { %370 = dma.done.wait (%p448_p6), %s110_s23, 128  }
  0x37   : > { %372 = vsyncadd (%p448_p6), %s110_s23, 4294967168  ;;  %v132_v0 = vld [vmem:[%s113_s24] sm:$0xff]  ;;  %s244_s25 = sshll.u32 %s509_s21, 1  ;;  %s246_s27 = sshll.u32 %s426_s10, 5 }
  0x38   : > { %v133_v1 = vrot.slane %v132_v0, 4  ;;  %s131_s26 = scalar_lea.vmem [#allocation5], %s244_s25  ;;  %s524_s30 = scalar_lea.hbm %s566_s1, %s246_s27 }
  0x39   : > { %s167_s17 = sshll.u32 %s131_s26, 4  ;;  %s154_s2 = scalar_lea.sflag [#allocation4], %s509_s21  ;;  %s519_s17 = int_to_ptr.vmem [resolvable:$true] %s167_s17 }
  0x3a   : > { %v134_v2 = vadd.f32 %v133_v1, %v132_v0  ;;  %s325_s3 = scalar_lea.vmem %s519_s17, 32  ;;  %p575_p10 = scmp.ne.s32.totalorder %s570_s18, 0 }
  0x3b   : > { %p326_p6 = scmp.ne.s32.totalorder %s519_s17, %s325_s3  ;;  %s394_s10 = smov [#allocation5]  }
  0x3c   : > { %v135_v3 = vrot.slane %v134_v2, 2  ;;  %s329_s4 = sshll.u32 %s394_s10, 4  ;;  %s330_s4 = int_to_ptr.vmem [resolvable:$false] %s329_s4 }
  0x3d   : > { %p327_p11 = pnand %p326_p6, %p575_p10  ;;  %s331_s5 = scalar_lea.vmem %s330_s4, 64 }
  0x3e   : > { %v136_v4 = vadd.f32 %v135_v3, %v134_v2  ;;  %p332_p4 = scmp.lt.s32.totalorder %s519_s17, %s330_s4  ;;  %p333_p9 = scmp.lt.s32.totalorder %s331_s5, %s325_s3 }
  0x3f   : > { %p328_p12 = pneg %p327_p11 }
  0x40   : > { %v137_v5 = vrot.slane %v136_v4, 1  ;;  %p334_p1 = por %p333_p9, %p332_p4 }
  0x42   : > { %v138_v6 = vadd.f32 %v137_v5, %v136_v4  ;;  %p335_p3 = pnand %p334_p1, %p328_p12 }
  0x44   : > { %v140_v7 = vmul.f32 0.125, %v138_v6 }
  0x46   : > { %v141_v8 = vsub.f32 %v132_v0, %v140_v7  ;;  %151 = vst [vmem:[%s131_s26] sm:$0x1] %v140_v7 }
  0x48   : > { %v142_v9 = vmul.f32 %v141_v8, %v141_v8 }
  0x4a   : > { %v143_v10 = vrot.slane %v142_v9, 4 }
  0x4c   : > { %v144_v11 = vadd.f32 %v143_v10, %v142_v9 }
  0x4e   : > { %v145_v12 = vrot.slane %v144_v11, 2 }
  0x50   : > { %v146_v13 = vadd.f32 %v145_v12, %v144_v11 }
  0x52   : > { %v147_v14 = vrot.slane %v146_v13, 1 }
  0x54   : > { %v148_v15 = vadd.f32 %v147_v14, %v146_v13 }
  0x56   : > { %v150_v16 = vmul.f32 0.14285715, %v148_v15 }
  0x58   : > { %152 = vst [vmem:[%s131_s26 + $0x1] sm:$0x1] %v150_v16 }
  0x59   : > { %338 = shalt.err (!%p335_p3)
}
  0x5a   : > { %s339_s11 = scalar_lea.hbm %s524_s30, 32  ;;  %s343_s16 = scalar_lea.hbm %s566_s1, 128 }
  0x5b   : > { %p340_p5 = scmp.ne.s32.totalorder %s524_s30, %s339_s11  ;;  %p344_p13 = scmp.lt.u32.totalorder %s524_s30, %s566_s1 }
  0x5c   : > { %p345_p0 = scmp.lt.u32.totalorder %s343_s16, %s339_s11  ;;  %p347_p6 = scmp.lt.u32.totalorder %s339_s11, %s524_s30 }
  0x5d   : > { %p341_p7 = pnand %p340_p5, %p575_p10 }
  0x5e   : > { %p346_p2 = por %p345_p0, %p344_p13 }
  0x5f   : > { %p342_p8 = pneg %p341_p7 }
  0x60   : > { %p348_p11 = por %p347_p6, %p346_p2 }
  0x62   : > { %p349_p12 = pnand %p348_p11, %p342_p8 }
  0x64   : > { %352 = shalt.err (!%p349_p12)
}
  0x65   : > { %251 = dma.vmem_to_hbm [thread:$0]  (%p575_p10), %s519_s17, 32, %s524_s30, %s154_s2  }
  0x66 PF: > { %p262_p4 = scmp.ge.s32.totalorder %s391_s9, 2  ;;  %s179_s22 = sand.u32 1, %s379_s6  }
  0x67   : > { %p576_p9 = scmp.ne.s32.totalorder %s571_s19, 0  ;;  %s180_s23 = scalar_lea.sflag [#allocation4], %s179_s22 }
  0x69   : > { %p258_p1 = pnand %p262_p4, %p576_p9 }
  0x6b   : > { %374 = dma.done.wait (!%p258_p1), %s180_s23, 32  }
  0x6c   : > { %376 = vsyncadd (!%p258_p1), %s180_s23, 4294967264  ;;  %p14_p3 = scmp.ge.s32.totalorder %s430_s12, 6   ;;  %s577_s6 = smov %s383_s7 }
  0x6d   : > { %s578_s7 = smov %s387_s8  ;;  %s579_s8 = smov %s442_s15 }
  0x6e   : > { %s580_s9 = smov %s430_s12  ;;  %16 = sbr.rel (!%p14_p3) target bundleno = 5 (0x5), region = 69 }
  0x75   :  { %185 = vsyncpa [#allocation3], 1 }
  0x76   :  { %187 = vsyncpa [#allocation3 + $0x1], 1 }
  0x77   :  { %188 = vsyncpa [#allocation4], 1 }
  0x78   :  { %190 = vsyncpa [#allocation4 + $0x1], 1 }

</bundles_post_ra>
